<compile_context>
chip_gen: v5e
topology: v5e:2x2
jax: 0.10.0
libtpu: 0.0.40
codegen_flags: <defaults>
</compile_context>

<pallas_src>
import math

import jax
import jax.numpy as jnp
from jax.experimental import pallas as pl
from jax.experimental.pallas import tpu as pltpu

LANE = 128
SUBLANE = 8
TILE_ROWS = 2048                       # ~1 MiB per f32 operand tile
_HIGHEST = jax.lax.Precision.HIGHEST   # full-f32 MXU passes (matches the jnp reference)


# ----------------------------------------------------------------------------
# ResidualWeight:  clamp(alpha,0,1)*x + (1-clamp(alpha,0,1))*residual
# ----------------------------------------------------------------------------
def _residual_weight_kernel(alpha_ref, x_ref, r_ref, o_ref):
    a = jnp.clip(alpha_ref[0], 0.0, 1.0)
    s = 1.0 - a                                          # hoisted scalar
    o_ref[...] = (a * x_ref[...] + s * r_ref[...]).astype(o_ref.dtype)


def residual_weight(x, residual, alpha, donate_input=False):
    """Elementwise blend, tiled over a lane-dense (rows, 128) slab."""
    assert x.shape == residual.shape, "input and residual must match"
    orig_shape = x.shape
    dtype = x.dtype
    numel = x.size
    rows = pl.cdiv(numel, LANE)

    if numel % LANE == 0:
        # Pad-free fast path: pure reshapes, no extra HBM traffic.
        rows_p = rows
        x2 = x.reshape(rows_p, LANE)
        r2 = residual.reshape(rows_p, LANE)
        unpad = lambda o: o.reshape(orig_shape)
    else:
        rows_p = ((rows + SUBLANE - 1) // SUBLANE) * SUBLANE
        padded = rows_p * LANE
        x2 = jnp.pad(x.reshape(-1), (0, padded - numel)).reshape(rows_p, LANE)
        r2 = jnp.pad(residual.reshape(-1), (0, padded - numel)).reshape(rows_p, LANE)
        unpad = lambda o: o.reshape(-1)[:numel].reshape(orig_shape)

    # 1-D row grid with double-buffered ~1 MiB tiles (6 MiB working set for f32,
    # under every generation's scoped-VMEM default). Small inputs use one block.
    tile_rows = rows_p if rows_p <= TILE_ROWS else TILE_ROWS
    grid = (pl.cdiv(rows_p, tile_rows),)

    alpha_arr = jnp.asarray(alpha, dtype=jnp.float32).reshape((1,))
    aliases = {1: 0} if donate_input else {}

    out2 = pl.pallas_call(
        _residual_weight_kernel,
        out_shape=jax.ShapeDtypeStruct((rows_p, LANE), dtype),
        grid=grid,
        in_specs=[
            pl.BlockSpec(memory_space=pltpu.SMEM),              # alpha scalar
            pl.BlockSpec((tile_rows, LANE), lambda i: (i, 0)),  # input rows
            pl.BlockSpec((tile_rows, LANE), lambda i: (i, 0)),  # residual rows
        ],
        out_specs=pl.BlockSpec((tile_rows, LANE), lambda i: (i, 0)),
        compiler_params=pltpu.CompilerParams(
            dimension_semantics=("parallel",)),
        input_output_aliases=aliases,
    )(alpha_arr, x2, r2)
    return unpad(out2)


# ----------------------------------------------------------------------------
# GraphConvolution (fused): support = x@W ; out = adj@support + b ; ReLU ;
# residual = x@W_res ; ResidualWeight blend.   Grid over batch.
# ----------------------------------------------------------------------------
def _gcn_layer_kernel(alpha_ref, x_ref, adj_ref, w_ref, wres_ref, b_ref, o_ref):
    x = x_ref[0]                                                    # (N, F_in)
    support = jnp.dot(x, w_ref[...],
                      preferred_element_type=jnp.float32, precision=_HIGHEST)
    out = jnp.dot(adj_ref[...], support,
                  preferred_element_type=jnp.float32, precision=_HIGHEST)
    out = jnp.maximum(out + b_ref[...], 0.0)                        # bias + ReLU
    resid = jnp.dot(x, wres_ref[...],
                    preferred_element_type=jnp.float32, precision=_HIGHEST)
    a = jnp.clip(alpha_ref[0], 0.0, 1.0)
    o_ref[0] = (a * out + (1.0 - a) * resid).astype(o_ref.dtype)


def gcn_layer(x, adj, w, w_res, bias, alpha):
    B, N, F_in = x.shape
    F_out = w.shape[1]
    alpha_arr = jnp.asarray(alpha, jnp.float32).reshape((1,))
    return pl.pallas_call(
        _gcn_layer_kernel,
        out_shape=jax.ShapeDtypeStruct((B, N, F_out), x.dtype),
        grid=(B,),
        in_specs=[
            pl.BlockSpec(memory_space=pltpu.SMEM),                 # alpha
            pl.BlockSpec((1, N, F_in), lambda b: (b, 0, 0)),       # x[b]
            pl.BlockSpec((N, N), lambda b: (0, 0)),                # adj
            pl.BlockSpec((F_in, F_out), lambda b: (0, 0)),         # W
            pl.BlockSpec((F_in, F_out), lambda b: (0, 0)),         # W_res
            pl.BlockSpec((1, F_out), lambda b: (0, 0)),            # bias
        ],
        out_specs=pl.BlockSpec((1, N, F_out), lambda b: (b, 0, 0)),
        compiler_params=pltpu.CompilerParams(
            dimension_semantics=("parallel",)),
    )(alpha_arr, x, adj, w, w_res, bias.reshape(1, F_out))


# ----------------------------------------------------------------------------
# BatchNorm1d (over channel = last dim, stats over batch*length) + ReLU.
# Matches torch's bn(x.transpose(1,2)).transpose(1,2) followed by ReLU.
# ----------------------------------------------------------------------------
def _bn_relu_kernel(x_ref, g_ref, b_ref, o_ref):
    x = x_ref[...].astype(jnp.float32)
    n = x.shape[0]
    mean = jnp.sum(x, axis=0, keepdims=True) * (1.0 / n)
    xc = x - mean
    var = jnp.sum(xc * xc, axis=0, keepdims=True) * (1.0 / n)       # biased var
    y = xc * jax.lax.rsqrt(var + 1e-5) * g_ref[...] + b_ref[...]
    o_ref[...] = jnp.maximum(y, 0.0).astype(o_ref.dtype)


def batchnorm_relu(x, gamma, beta):
    # TODO(synk): single-block kernel; a very large B*L would need a tiled two-pass
    # reduction, not required at these activation sizes.
    B, L, C = x.shape
    out = pl.pallas_call(
        _bn_relu_kernel,
        out_shape=jax.ShapeDtypeStruct((B * L, C), x.dtype),
        in_specs=[
            pl.BlockSpec((B * L, C), lambda: (0, 0)),
            pl.BlockSpec((1, C), lambda: (0, 0)),
            pl.BlockSpec((1, C), lambda: (0, 0)),
        ],
        out_specs=pl.BlockSpec((B * L, C), lambda: (0, 0)),
    )(x.reshape(B * L, C), gamma.reshape(1, C), beta.reshape(1, C))
    return out.reshape(B, L, C)


# ----------------------------------------------------------------------------
# Multi-head GAT.  Grid over (batch, head).
# Faithful to the torch code: h' is broadcast over the query axis and the sum runs
# over keys, so each head is h' * rowsum(softmax(leakyrelu(h'h'^T))).
# (The `a` attention parameters of the torch module are unused in its forward.)
# ----------------------------------------------------------------------------
def _gat_head_kernel(h_ref, w_ref, o_ref):
    h = h_ref[0]                                                    # (N, F)
    w = w_ref[0]                                                    # (F, D)
    hp = jnp.dot(h, w, preferred_element_type=jnp.float32, precision=_HIGHEST)
    e = jax.lax.dot_general(hp, hp, (((1,), (1,)), ((), ())),
                            preferred_element_type=jnp.float32,
                            precision=_HIGHEST)                     # (N, N)
    e = jnp.where(e > 0, e, 0.2 * e)                                # LeakyReLU(0.2)
    e = e - jnp.max(e, axis=-1, keepdims=True)
    p = jnp.exp(e)
    attn = p / jnp.sum(p, axis=-1, keepdims=True)
    out = hp * jnp.sum(attn, axis=-1, keepdims=True)
    o_ref[0, 0] = out.astype(o_ref.dtype)


def gat_multihead(h, w_heads, alpha):
    B, N, F = h.shape
    H, _, D = w_heads.shape
    heads = pl.pallas_call(
        _gat_head_kernel,
        out_shape=jax.ShapeDtypeStruct((B, H, N, D), h.dtype),
        grid=(B, H),
        in_specs=[
            pl.BlockSpec((1, N, F), lambda b, hd: (b, 0, 0)),
            pl.BlockSpec((1, F, D), lambda b, hd: (hd, 0, 0)),
        ],
        out_specs=pl.BlockSpec((1, 1, N, D), lambda b, hd: (b, hd, 0, 0)),
        compiler_params=pltpu.CompilerParams(
            dimension_semantics=("parallel", "parallel")),
    )(h, w_heads)
    gat_out = jnp.transpose(heads, (0, 2, 1, 3)).reshape(B, N, H * D)
    return residual_weight(gat_out, h, alpha, donate_input=True)


# ----------------------------------------------------------------------------
# TCNBlock: conv1d(k=3, pad=1, dil=1) -> BN -> ReLU -> (dropout=id) -> blend.
# Channels-last layout (B, L, C): the conv is three shifted (L, Cin)@(Cin, Cout)
# matmuls on the MXU. Grid over batch.
# ----------------------------------------------------------------------------
def _conv1d_k3_kernel(xp_ref, w_ref, b_ref, o_ref):
    xp = xp_ref[0]                                                  # (L+2, C_in)
    L = o_ref.shape[1]
    acc = jnp.dot(xp[0:L, :], w_ref[0],
                  preferred_element_type=jnp.float32, precision=_HIGHEST)
    acc = acc + jnp.dot(xp[1:L + 1, :], w_ref[1],
                        preferred_element_type=jnp.float32, precision=_HIGHEST)
    acc = acc + jnp.dot(xp[2:L + 2, :], w_ref[2],
                        preferred_element_type=jnp.float32, precision=_HIGHEST)
    o_ref[0] = (acc + b_ref[...]).astype(o_ref.dtype)


def tcn_block(x, conv_w, conv_b, gamma, beta, alpha):
    B, L, C_in = x.shape
    K, _, C_out = conv_w.shape
    xp = jnp.pad(x, ((0, 0), (1, 1), (0, 0)))                       # 'same' pad, k=3
    conv = pl.pallas_call(
        _conv1d_k3_kernel,
        out_shape=jax.ShapeDtypeStruct((B, L, C_out), x.dtype),
        grid=(B,),
        in_specs=[
            pl.BlockSpec((1, L + 2, C_in), lambda b: (b, 0, 0)),
            pl.BlockSpec((K, C_in, C_out), lambda b: (0, 0, 0)),
            pl.BlockSpec((1, C_out), lambda b: (0, 0)),
        ],
        out_specs=pl.BlockSpec((1, L, C_out), lambda b: (b, 0, 0)),
        compiler_params=pltpu.CompilerParams(
            dimension_semantics=("parallel",)),
    )(xp, conv_w, conv_b.reshape(1, C_out))
    y = batchnorm_relu(conv, gamma, beta)
    # in_channels == out_channels -> residual_layer is None (identity residual).
    return residual_weight(y, x, alpha, donate_input=True)


# ----------------------------------------------------------------------------
# Full module forward
# ----------------------------------------------------------------------------
def gcn_gat_tcn_forward(params, x, adj):
    h = gcn_layer(x, adj, params["gc_w"], params["gc_wres"], params["gc_b"],
                  params["gc_alpha"])
    h = batchnorm_relu(h, params["bn1_g"], params["bn1_b"])
    h = gat_multihead(h, params["gat_w"], params["gat_alpha"])
    return tcn_block(h, params["tcn_w"], params["tcn_b"],
                     params["bn_tcn_g"], params["bn_tcn_b"], params["tcn_alpha"])


# ----------------------------------------------------------------------------
# Pure-JAX reference (same math, same parameter layout)
# ----------------------------------------------------------------------------
def reference_forward(params, x, adj):
    def blend(a_param, inp, res):
        a = jnp.clip(a_param, 0.0, 1.0)
        return a * inp + (1.0 - a) * res

    def bn_relu(h, g, b):
        m = jnp.mean(h, axis=(0, 1), keepdims=True)
        v = jnp.mean((h - m) ** 2, axis=(0, 1), keepdims=True)
        return jnp.maximum((h - m) * jax.lax.rsqrt(v + 1e-5) * g + b, 0.0)

    # GCN
    support = jnp.einsum("bnf,fo->bno", x, params["gc_w"], precision=_HIGHEST)
    out = jnp.einsum("nm,bmo->bno", adj, support, precision=_HIGHEST) + params["gc_b"]
    resid = jnp.einsum("bnf,fo->bno", x, params["gc_wres"], precision=_HIGHEST)
    h = blend(params["gc_alpha"], jnp.maximum(out, 0.0), resid)
    h = bn_relu(h, params["bn1_g"], params["bn1_b"])
    # GAT
    heads = []
    for i in range(params["gat_w"].shape[0]):
        hp = jnp.einsum("bnf,fd->bnd", h, params["gat_w"][i], precision=_HIGHEST)
        e = jnp.einsum("bnd,bmd->bnm", hp, hp, precision=_HIGHEST)
        e = jnp.where(e > 0, e, 0.2 * e)
        attn = jax.nn.softmax(e, axis=-1)
        heads.append(hp * jnp.sum(attn, axis=-1, keepdims=True))
    h2 = blend(params["gat_alpha"], jnp.concatenate(heads, axis=-1), h)
    # TCN
    L = h2.shape[1]
    xp = jnp.pad(h2, ((0, 0), (1, 1), (0, 0)))
    conv = (jnp.einsum("blc,co->blo", xp[:, 0:L], params["tcn_w"][0], precision=_HIGHEST)
            + jnp.einsum("blc,co->blo", xp[:, 1:L + 1], params["tcn_w"][1], precision=_HIGHEST)
            + jnp.einsum("blc,co->blo", xp[:, 2:L + 2], params["tcn_w"][2], precision=_HIGHEST)
            + params["tcn_b"])
    y = bn_relu(conv, params["bn_tcn_g"], params["bn_tcn_b"])
    return blend(params["tcn_alpha"], y, h2)


if __name__ == "__main__":
    B, N = 2, 16
    nfeat, nhid, nout, H = 16, 32, 32, 4
    dph = nout // H

    key = jax.random.PRNGKey(0)
    ks = jax.random.split(key, 10)

    x = jax.random.normal(ks[0], (B, N, nfeat), jnp.float32)
    adj_raw = jax.random.uniform(ks[1], (N, N), jnp.float32)
    adj = adj_raw / jnp.sum(adj_raw, axis=-1, keepdims=True)   # stand-in for np.load(mat_path)

    s_gc = 1.0 / math.sqrt(nhid)
    s_res = 1.0 / math.sqrt(nfeat)
    s_gat = 1.0 / math.sqrt(nhid)
    s_tcn = 1.0 / math.sqrt(3 * nout)
    params = {
        "gc_w": jax.random.uniform(ks[2], (nfeat, nhid), jnp.float32, -s_gc, s_gc),
        "gc_b": jax.random.uniform(ks[3], (nhid,), jnp.float32, -s_gc, s_gc),
        "gc_wres": jax.random.uniform(ks[4], (nfeat, nhid), jnp.float32, -s_res, s_res),
        "gc_alpha": jnp.float32(0.5),
        "bn1_g": jnp.ones((nhid,), jnp.float32),
        "bn1_b": jnp.zeros((nhid,), jnp.float32),
        "gat_w": jax.random.uniform(ks[5], (H, nhid, dph), jnp.float32, -s_gat, s_gat),
        "gat_alpha": jnp.float32(0.5),
        "tcn_w": jax.random.uniform(ks[6], (3, nout, nout), jnp.float32, -s_tcn, s_tcn),
        "tcn_b": jax.random.uniform(ks[7], (nout,), jnp.float32, -s_tcn, s_tcn),
        "bn_tcn_g": jnp.ones((nout,), jnp.float32),
        "bn_tcn_b": jnp.zeros((nout,), jnp.float32),
        "tcn_alpha": jnp.float32(0.5),
    }

    out = jax.block_until_ready(gcn_gat_tcn_forward(params, x, adj))
    ref = reference_forward(params, x, adj)
    assert out.shape == (B, N, nout)
    assert jnp.allclose(out, ref, atol=1e-3, rtol=1e-3), "full-forward mismatch vs reference"

    # Exercise the tiled (multi-block grid) path of the residual-weight kernel.
    xb = jax.random.normal(ks[8], (2, 8, 256, 256), jnp.float32)   # 1M elems -> 4 row tiles
    rb = jax.random.normal(ks[9], (2, 8, 256, 256), jnp.float32)
    ob = jax.block_until_ready(residual_weight(xb, rb, 0.3))
    a = jnp.clip(jnp.float32(0.3), 0.0, 1.0)
    assert jnp.allclose(ob, a * xb + (1.0 - a) * rb, atol=1e-6), "tiled blend mismatch"

    print("KERNEL_OK")
</pallas_src>

<mosaic_0001>
module attributes {stable_mosaic.version = 11 : i64} {
  func.func @_gcn_layer_kernel(%arg0: i32, %arg1: memref<1xf32, #tpu.memory_space<smem>>, %arg2: memref<1x16x16xf32, #tpu.memory_space<vmem>>, %arg3: memref<16x16xf32, #tpu.memory_space<vmem>>, %arg4: memref<16x32xf32, #tpu.memory_space<vmem>>, %arg5: memref<16x32xf32, #tpu.memory_space<vmem>>, %arg6: memref<1x32xf32, #tpu.memory_space<vmem>>, %arg7: memref<1x16x32xf32, #tpu.memory_space<vmem>>) attributes {dimension_semantics = [#tpu.dimension_semantics<parallel>], iteration_bounds = array<i64: 2>, scalar_prefetch = 0 : i64, scratch_operands = 0 : i64, tpu.core_type = #tpu.core_type<tc>, window_params = [{transform_indices = @transform_0, window_bounds = array<i64: 1>}, {transform_indices = @transform_1, window_bounds = array<i64: 1, 16, 16>}, {pipeline_mode = #tpu.pipeline_mode<synchronous>, transform_indices = @transform_2, window_bounds = array<i64: 16, 16>}, {pipeline_mode = #tpu.pipeline_mode<synchronous>, transform_indices = @transform_3, window_bounds = array<i64: 16, 32>}, {pipeline_mode = #tpu.pipeline_mode<synchronous>, transform_indices = @transform_4, window_bounds = array<i64: 16, 32>}, {pipeline_mode = #tpu.pipeline_mode<synchronous>, transform_indices = @transform_5, window_bounds = array<i64: 1, 32>}, {transform_indices = @transform_6, window_bounds = array<i64: 1, 16, 32>}]} {
    %c0 = arith.constant 0 : index
    %c0_0 = arith.constant 0 : index
    %c0_1 = arith.constant 0 : index
    %0 = vector.load %arg2[%c0, %c0_0, %c0_1] : memref<1x16x16xf32, #tpu.memory_space<vmem>>, vector<1x16x16xf32>
    %1 = vector.shape_cast %0 : vector<1x16x16xf32> to vector<16x16xf32>
    %c0_2 = arith.constant 0 : index
    %c0_3 = arith.constant 0 : index
    %2 = vector.load %arg4[%c0_2, %c0_3] : memref<16x32xf32, #tpu.memory_space<vmem>>, vector<16x32xf32>
    %cst = arith.constant dense<0.000000e+00> : vector<16x32xf32>
    %3 = tpu.matmul %1, %2, %cst {dimension_numbers = #tpu.dot_dimension_numbers<[1], [0], [0], [1], [0, 0, 1, 1], [], []>, precision = #tpu.contract_precision<fp32>} : vector<16x16xf32>, vector<16x32xf32>, vector<16x32xf32> -> vector<16x32xf32>
    %c0_4 = arith.constant 0 : index
    %c0_5 = arith.constant 0 : index
    %4 = vector.load %arg3[%c0_4, %c0_5] : memref<16x16xf32, #tpu.memory_space<vmem>>, vector<16x16xf32>
    %cst_6 = arith.constant dense<0.000000e+00> : vector<16x32xf32>
    %5 = tpu.matmul %4, %3, %cst_6 {dimension_numbers = #tpu.dot_dimension_numbers<[1], [0], [0], [1], [0, 0, 1, 1], [], []>, precision = #tpu.contract_precision<fp32>} : vector<16x16xf32>, vector<16x32xf32>, vector<16x32xf32> -> vector<16x32xf32>
    %c0_7 = arith.constant 0 : index
    %c0_8 = arith.constant 0 : index
    %6 = vector.load %arg6[%c0_7, %c0_8] : memref<1x32xf32, #tpu.memory_space<vmem>>, vector<1x32xf32>
    %7 = vector.broadcast %6 : vector<1x32xf32> to vector<16x32xf32>
    %8 = arith.addf %5, %7 : vector<16x32xf32>
    %cst_9 = arith.constant 0.000000e+00 : f32
    %9 = vector.broadcast %cst_9 : f32 to vector<16x32xf32>
    %10 = arith.maximumf %8, %9 : vector<16x32xf32>
    %c0_10 = arith.constant 0 : index
    %c0_11 = arith.constant 0 : index
    %11 = vector.load %arg5[%c0_10, %c0_11] : memref<16x32xf32, #tpu.memory_space<vmem>>, vector<16x32xf32>
    %cst_12 = arith.constant dense<0.000000e+00> : vector<16x32xf32>
    %12 = tpu.matmul %1, %11, %cst_12 {dimension_numbers = #tpu.dot_dimension_numbers<[1], [0], [0], [1], [0, 0, 1, 1], [], []>, precision = #tpu.contract_precision<fp32>} : vector<16x16xf32>, vector<16x32xf32>, vector<16x32xf32> -> vector<16x32xf32>
    %c0_13 = arith.constant 0 : index
    %13 = memref.load %arg1[%c0_13] : memref<1xf32, #tpu.memory_space<smem>>
    %cst_14 = arith.constant 0.000000e+00 : f32
    %cst_15 = arith.constant 1.000000e+00 : f32
    %14 = arith.maximumf %cst_14, %13 : f32
    %15 = arith.minimumf %cst_15, %14 : f32
    %16 = vector.broadcast %15 : f32 to vector<16x32xf32>
    %17 = arith.mulf %16, %10 : vector<16x32xf32>
    %cst_16 = arith.constant 1.000000e+00 : f32
    %18 = arith.subf %cst_16, %15 : f32
    %19 = vector.broadcast %18 : f32 to vector<16x32xf32>
    %20 = arith.mulf %19, %12 : vector<16x32xf32>
    %21 = arith.addf %17, %20 : vector<16x32xf32>
    %c0_17 = arith.constant 0 : index
    %c0_18 = arith.constant 0 : index
    %c0_19 = arith.constant 0 : index
    %22 = vector.load %arg7[%c0_17, %c0_18, %c0_19] : memref<1x16x32xf32, #tpu.memory_space<vmem>>, vector<1x16x32xf32>
    %23 = vector.shape_cast %22 : vector<1x16x32xf32> to vector<16x32xf32>
    %24 = vector.shape_cast %21 : vector<16x32xf32> to vector<1x16x32xf32>
    tpu.vector_store %arg7[%c0_17, %c0_18, %c0_19], %24 {strides = array<i32>} : memref<1x16x32xf32, #tpu.memory_space<vmem>>, vector<1x16x32xf32>,
    return
  }
  func.func @transform_0(%arg0: i32) -> i32 {
    %c0_i32 = arith.constant 0 : i32
    %c0_i32_0 = arith.constant 0 : i32
    return %c0_i32 : i32
  }
  func.func @transform_1(%arg0: i32) -> (i32, i32, i32) {
    %c0_i32 = arith.constant 0 : i32
    %c0_i32_0 = arith.constant 0 : i32
    %c0_i32_1 = arith.constant 0 : i32
    return %arg0, %c0_i32, %c0_i32_0 : i32, i32, i32
  }
  func.func @transform_2(%arg0: i32) -> (i32, i32) {
    %c0_i32 = arith.constant 0 : i32
    %c0_i32_0 = arith.constant 0 : i32
    %c0_i32_1 = arith.constant 0 : i32
    return %c0_i32, %c0_i32_0 : i32, i32
  }
  func.func @transform_3(%arg0: i32) -> (i32, i32) {
    %c0_i32 = arith.constant 0 : i32
    %c0_i32_0 = arith.constant 0 : i32
    %c0_i32_1 = arith.constant 0 : i32
    return %c0_i32, %c0_i32_0 : i32, i32
  }
  func.func @transform_4(%arg0: i32) -> (i32, i32) {
    %c0_i32 = arith.constant 0 : i32
    %c0_i32_0 = arith.constant 0 : i32
    %c0_i32_1 = arith.constant 0 : i32
    return %c0_i32, %c0_i32_0 : i32, i32
  }
  func.func @transform_5(%arg0: i32) -> (i32, i32) {
    %c0_i32 = arith.constant 0 : i32
    %c0_i32_0 = arith.constant 0 : i32
    %c0_i32_1 = arith.constant 0 : i32
    return %c0_i32, %c0_i32_0 : i32, i32
  }
  func.func @transform_6(%arg0: i32) -> (i32, i32, i32) {
    %c0_i32 = arith.constant 0 : i32
    %c0_i32_0 = arith.constant 0 : i32
    %c0_i32_1 = arith.constant 0 : i32
    return %arg0, %c0_i32, %c0_i32_0 : i32, i32, i32
  }
}

</mosaic_0001>

<bundles_post_ra>
// kernel: tpu_custom_call.1
= control target key start
LH: loop header
LB: loop body
LE: loop exit
PB: predicated region body
PF: predicated region fallthrough
CT: control target
= control target key end

     0   :  { %s1653_s0 = inlined_call_operand.<no memory space> [shape: f32[1], index: 0, kind: input, shape index: {}]   ;;  %s1654_s1 = inlined_call_operand.hbm [shape: f32[2,16,16], index: 1, kind: input, shape index: {}]   ;;  %s1655_s2 = inlined_call_operand.hbm [shape: f32[16,16], index: 2, kind: input, shape index: {}]   ;;  %s1656_s3 = inlined_call_operand.hbm [shape: f32[16,32], index: 3, kind: input, shape index: {}]   ;;  %s1657_s4 = inlined_call_operand.hbm [shape: f32[16,32], index: 4, kind: input, shape index: {}]   ;;  %s1658_s5 = inlined_call_operand.vmem [shape: f32[1,32], index: 5, kind: input, shape index: {}]   ;;  %s1659_s6 = inlined_call_operand.hbm [shape: f32[2,16,32], index: 6, kind: output, shape index: {}]  }
   0x1   :  { %11 = sst [smem:[#allocation2]] %s1653_s0 }
   0x2   :  { %12 = vsyncpa [#allocation4], 0 }
   0x3   :  { %14 = vsyncpa [#allocation4 + $0x1], 0 }
   0x4   :  { %15 = vsyncpa [#allocation7], 0 }
   0x5   :  { %16 = vsyncpa [#allocation10], 0 }
   0x6   :  { %17 = vsyncpa [#allocation5], 0 }
   0x7   :  { %19 = vsyncpa [#allocation5 + $0x1], 0  ;;  %s1406_s23 = smov 0   ;;  %s1408_s24 = smov 0  }
   0x8   :  { %s1410_s25 = smov 0   ;;  %s1412_s26 = smov 0  }
   0x9 LB: > { %s1427_s0 = sadd.s32 4294967295, %s1357_s26   ;;  %s1053_s27 = sadd.s32 4294967294, %s1357_s26   ;;  %s1357_s26 = sphi %s1412_s26, %s1672_s26   ;;  %s1353_s25 = sphi %s1410_s25, %s1671_s25   ;;  %s1349_s24 = sphi %s1408_s24, %s1670_s24   ;;  %s1345_s23 = sphi %s1406_s23, %s1669_s23  }
   0xa   : > { %p66_p0 = scmp.ne.s32.totalorder %s1349_s24, %s1345_s23  ;;  %p67_p1 = scmp.eq.s32.totalorder %s1427_s0, 0 }
   0xb   : > { %p174_p2 = scmp.eq.s32.totalorder %s1427_s0, 1  ;;  %p180_p3 = scmp.eq.s32.totalorder %s1053_s27, 1 }
   0xc   : > { %p1436_p4 = por %p67_p1, %p66_p0  ;;  %p1054_p5 = scmp.ge.s32.totalorder %s1357_s26, 1 }
   0xd   : > { %p1441_p6 = por %p180_p3, %p66_p0  ;;  %p187_p7 = scmp.lt.s32.totalorder %s1357_s26, 3 }
   0xe   : > { %s201_s8 = sshll.u32 %s1655_s2, 4  ;;  %s1359_s10 = smov [#allocation6]   ;;  %s202_s8 = int_to_ptr.hbm [resolvable:$true] %s201_s8 }
   0xf   : > { %p1449_p8 = pnand %p1054_p5, %p187_p7  ;;  %s203_s11 = sshll.u32 %s1359_s10, 4  ;;  %s204_s11 = int_to_ptr.vmem [resolvable:$true] %s203_s11 }
  0x10   : > { %s215_s15 = sshll.u32 %s1656_s3, 4  ;;  %s1660_s16 = smov 128   ;;  %s216_s15 = int_to_ptr.hbm [resolvable:$true] %s215_s15 }
  0x11   : > { %p1095_p9 = pneg %p1449_p8  ;;  %s1361_s17 = smov 8  }
  0x12   : > { %s1362_s18 = smov [#allocation8]   ;;  %s229_s22 = sshll.u32 %s1657_s4, 4  ;;  %s230_s22 = int_to_ptr.hbm [resolvable:$true] %s229_s22 }
  0x13   : > { %p1457_p10 = pnand %p1095_p9, %p67_p1  ;;  %s217_s19 = sshll.u32 %s1362_s18, 4  ;;  %s218_s19 = int_to_ptr.vmem [resolvable:$true] %s217_s19 }
  0x14   : > { %s1363_s27 = smov [#allocation9]   ;;  %s1479_s7 = sadd.s32 1, %s1357_s26  }
  0x15   : > { %1098 = dma.hbm_to_vmem [thread:$0]  (!%p1457_p10), %s202_s8, 256, %s204_s11, [#allocation7], %s1660_s16, %s1660_s16, %s1361_s17  }
  0x16   : > { %1101 = dma.hbm_to_vmem [thread:$0]  (!%p1457_p10), %s216_s15, 256, %s218_s19, [#allocation7], %s1660_s16, %s1660_s16, %s1361_s17  }
  0x17   : > { %s231_s30 = sshll.u32 %s1363_s27, 4  ;;  %s50_s8 = ssub.s32 %s1357_s26, %s1479_s7  ;;  %s232_s30 = int_to_ptr.vmem [resolvable:$true] %s231_s30 }
  0x18   : > { %1104 = dma.hbm_to_vmem [thread:$0]  (!%p1457_p10), %s230_s22, 256, %s232_s30, [#allocation10], %s1660_s16, %s1660_s16, %s1361_s17  }
  0x19   : > { %s53_s10 = sadd.s32 1, %s1353_s25  ;;  %p51_p12 = scmp.eq.s32.totalorder %s50_s8, 0 }
  0x1a   : > { %p60_p13 = scmp.ne.s32.totalorder %s1353_s25, %s1349_s24  ;;  %p61_p0 = scmp.eq.s32.totalorder %s1357_s26, 0 }
  0x1b   : > { %s1493_s11 = scalar_select %p51_p12, %s1353_s25, %s53_s10  }
  0x1c   : > { %p1497_p3 = por %p174_p2, %p60_p13  ;;  %p1116_p5 = scmp.lt.s32.totalorder %s1357_s26, 2 }
  0x1d   : > { %s248_s14 = sand.u32 1, %s1353_s25   ;;  %s1073_s12 = sshll.u32 %s1357_s26, 4 }
  0x1e   : > { %p62_p7 = por %p61_p0, %p60_p13  ;;  %s1059_s15 = sshll.u32 %s248_s14, 4 }
  0x1f   : > { %s257_s20 = scalar_lea.hbm %s1654_s1, %s1073_s12  ;;  %s252_s22 = scalar_lea.vmem [#allocation3], %s1059_s15 }
  0x20   : > { %s258_s21 = sshll.u32 %s257_s20, 4  ;;  %s260_s27 = sshll.u32 %s252_s22, 4  ;;  %s259_s21 = int_to_ptr.hbm [resolvable:$true] %s258_s21  ;;  %s261_s27 = int_to_ptr.vmem [resolvable:$true] %s260_s27 }
  0x21   : > { %p1507_p9 = pnand %p1116_p5, %p62_p7  ;;  %s249_s8 = scalar_lea.sflag [#allocation4], %s248_s14 }
  0x22   : > { %s1253_s10 = sshra.s32 %s259_s21, 4  ;;  %s1260_s15 = scalar_lea.hbm %s1654_s1, 32  ;;  %s1254_s10 = int_to_ptr.hbm [resolvable:$true] %s1253_s10 }
  0x23   : > { %s1255_s16 = scalar_lea.hbm %s1254_s10, 16  ;;  %p1257_p10 = pneg %p1507_p9 }
  0x24   : > { %p1256_p2 = scmp.ne.s32.totalorder %s1254_s10, %s1255_s16  ;;  %p1261_p0 = scmp.lt.s32.totalorder %s1254_s10, %s1654_s1 }
  0x25   : > { %p1262_p5 = scmp.lt.s32.totalorder %s1260_s15, %s1255_s16 }
  0x26   : > { %p1258_p12 = pnand %p1257_p10, %p1256_p2 }
  0x27   : > { %p1263_p7 = por %p1262_p5, %p1261_p0 }
  0x28   : > { %p1259_p13 = pneg %p1258_p12 }
  0x2a   : > { %p1264_p11 = pnand %p1263_p7, %p1259_p13 }
  0x2c   : > { %1267 = shalt.err (!%p1264_p11)
}
  0x2d   : > { %s1667_s14 = smov 128   ;;  %272 = sbr.rel (%p1449_p8) target bundleno = 423 (0x1a7), region = 44 }
  0x2e   : > { %1108 = dma.hbm_to_vmem [thread:$0]  (!%p1507_p9), %s259_s21, 256, %s261_s27, %s249_s8, %s1667_s14, %s1667_s14, %s1361_s17  }
  0x2f   : > { %s1527_s22 = sand.u32 (!%p1449_p8), 1, %s1349_s24  }
  0x30   : > { %s1063_s16 = sshll.u32 (!%p1449_p8), %s1527_s22, 4  ;;  %s275_s10 = scalar_lea.sflag (!%p1449_p8), [#allocation4], %s1527_s22 }
  0x31   : > { %s278_s12 = scalar_lea.vmem (!%p1449_p8), [#allocation3], %s1063_s16 }
  0x32   : > { %1328 = dma.done.wait (%p1436_p4), %s275_s10, 256  }
  0x33   : > { %1330 = vsyncadd (%p1436_p4), %s275_s10, 4294967040 }
  0x34   : > { %1332 = dma.done.wait (%p67_p1), [#allocation7], 512  }
  0x35   : > { %1334 = vsyncadd (%p67_p1), [#allocation7], 4294966784 }
  0x36   : > { %1336 = dma.done.wait (%p67_p1), [#allocation10], 256  }
  0x37   : > { %1338 = vsyncadd (%p67_p1), [#allocation10], 4294967040  ;;  %vm327_vm0 = vcmask 130048   ;;  %v326_v0 = vld [vmem:[#allocation8 + $0x8] sm:$0xff]  ;;  %v325_v1 = vld [vmem:[#allocation8] sm:$0xff]  ;;  %s920_s17 = sld [smem:[#allocation2]] }
  0x38   : > { %v324_v2 = vld [vmem:[%s278_s12 + $0x8] sm:$0xff]  ;;  %v348_v3 = vand.u32 4294901760, %v326_v0  ;;  %v350_v4 = vand.u32 4294901760, %v325_v1  ;;  %v323_v6 = vld [vmem:[%s278_s12] sm:$0xff]  ;;  %s1364_s21 = smov 0.0   ;;  %s1365_s30 = smov 1.0  }
  0x39   : > { %v332_v5 = vsel %vm327_vm0, %v324_v2, 0  ;;  %v329_v8 = vsel %vm327_vm0, %v323_v6, 0  ;;  %v524_v30 = vld [vmem:[#allocation6] sm:$0xff]  ;;  %v525_v40 = vld [vmem:[#allocation6 + $0x8] sm:$0xff]  ;;  %s1074_s15 = sshll.u32 %s1427_s0, 4  ;;  %vm932_vm1 = vcmask 261120  }
  0x3a   : > { %v1546_v7 = vand.u32 4294901760, %v332_v5  ;;  %1075 = vmatpush.msra.mxu2 %v348_v3  ;;  %v384_v9 = vsub.f32 %v326_v0, %v348_v3  ;;  %v390_v10 = vsub.f32 %v325_v1, %v350_v4  ;;  %349 = vmatpush.msra.mxu0 %v348_v3  ;;  %v1549_v11 = vand.u32 4294901760, %v329_v8  ;;  %v729_v48 = vld [vmem:[#allocation9 + $0x8] sm:$0xff]  ;;  %v728_v56 = vld [vmem:[#allocation9] sm:$0xff]  ;;  %s947_s14 = scalar_lea.hbm %s1659_s6, %s1074_s15  ;;  %s322_s10 = scalar_lea.vmem [#allocation11], %s1063_s16 }
  0x3b   : > { %v531_v32 = vsel %vm327_vm0, %v524_v30, 0  ;;  %v534_v45 = vsel %vm327_vm0, %v525_v40, 0  ;;  %v744_v53 = vand.u32 4294901760, %v729_v48  ;;  %v746_v59 = vand.u32 4294901760, %v728_v56  ;;  %s948_s0 = sshll.u32 %s322_s10, 4  ;;  %s950_s12 = sshll.u32 %s947_s14, 4  ;;  %s949_s0 = int_to_ptr.vmem [resolvable:$true] %s948_s0  ;;  %s951_s12 = int_to_ptr.hbm [resolvable:$true] %s950_s12 }
  0x3c   : > { %v1552_v12 = vsub.f32 %v332_v5, %v1546_v7  ;;  %1076 = vmatpush.msra.mxu2 %v350_v4  ;;  %v385_v13 = vand.u32 4294901760, %v384_v9  ;;  %v391_v14 = vand.u32 4294901760, %v390_v10  ;;  %v1555_v15 = vsub.f32 %v329_v8, %v1549_v11  ;;  %351 = vmatpush.msra.mxu0 %v350_v4  ;;  %s936_s28 = scalar_lea.sflag [#allocation5], %s1527_s22  ;;  %s1297_s9 = sshra.s32 %s951_s12, 4  ;;  %s1298_s9 = int_to_ptr.hbm [resolvable:$true] %s1297_s9 }
  0x3d   : > { %v1584_v38 = vand.u32 4294901760, %v531_v32  ;;  %v1588_v52 = vand.u32 4294901760, %v534_v45  ;;  %v780_v58 = vsub.f32 %v729_v48, %v744_v53  ;;  %v786_v0 = vsub.f32 %v728_v56, %v746_v59  ;;  %s921_s27 = smax.f32 %s1364_s21, %s920_s17  ;;  %s1299_s17 = scalar_lea.hbm %s1298_s9, 16 }
  0x3e   : > { %v1558_v16 = vand.u32 4294901760, %v1552_v12  ;;  %420 = vmatpush.msrb.mxu2 %v384_v9  ;;  %v386_v17 = vsub.f32 %v384_v9, %v385_v13  ;;  %v392_v18 = vsub.f32 %v390_v10, %v391_v14  ;;  %v1561_v19 = vand.u32 4294901760, %v1555_v15  ;;  %483 = vmatpush.msrb.mxu0 %v385_v13  ;;  %s1612_s8 = smin.f32 %s1365_s30, %s921_s27  ;;  %p1300_p1 = scmp.ne.s32.totalorder %s1298_s9, %s1299_s17 }
  0x3f   : > { %v555_v42 = vsub.f32 %v531_v32, %v1584_v38  ;;  %v563_v62 = vsub.f32 %v534_v45, %v1588_v52  ;;  %v781_v63 = vand.u32 4294901760, %v780_v58  ;;  %s926_s18 = ssub.f32 1.0, %s1612_s8  ;;  %v923_v56 = vstv %s1612_s8  ;;  %s1303_s27 = scalar_lea.hbm %s1659_s6, 32 }
  0x40   : > { %v363_v20 = vsub.f32 %v1552_v12, %v1558_v16  ;;  %423 = vmatpush.msrb.mxu2 %v390_v10  ;;  %v387_v21 = vand.u32 4294901760, %v386_v17  ;;  %v393_v22 = vand.u32 4294901760, %v392_v18  ;;  %v355_v23 = vsub.f32 %v1555_v15, %v1561_v19  ;;  %487 = vmatpush.msrb.mxu0 %v391_v14  ;;  %p1301_p4 = pnand %p1300_p1, %p1497_p3  ;;  %p1304_p11 = scmp.lt.s32.totalorder %s1298_s9, %s1659_s6 }
  0x41   : > { %v556_v51 = vand.u32 4294901760, %v555_v42  ;;  %v564_v6 = vand.u32 4294901760, %v563_v62  ;;  %v782_v8 = vsub.f32 %v780_v58, %v781_v63  ;;  %p1305_p9 = scmp.lt.s32.totalorder %s1303_s27, %s1299_s17 }
  0x42   : > { %v1567_v24 = vand.u32 4294901760, %v363_v20  ;;  %1077 = vmatpush.msra.mxu3 %v387_v21  ;;  %388 = vmatpush.msra.mxu1 %v387_v21  ;;  %v1569_v25 = vand.u32 4294901760, %v355_v23  ;;  %p1302_p8 = pneg %p1301_p4 }
  0x43   : > { %v557_v61 = vsub.f32 %v555_v42, %v556_v51  ;;  %v565_v17 = vsub.f32 %v563_v62, %v564_v6  ;;  %v783_v18 = vand.u32 4294901760, %v782_v8  ;;  %p1306_p2 = por %p1305_p9, %p1304_p11 }
  0x44   : > { %365 = vmatmul.f32.vlgmr.msra.gmra.mxu2 %v1567_v24  ;;  %1078 = vmatpush.msra.mxu3 %v393_v22 }
  0x45   : > { %394 = vmatpush.msra.mxu1 %v393_v22  ;;  %400 = vmatmul.f32.vlgmr.msra.gmra.mxu3 %v1546_v7  ;;  %v558_v5 = vand.u32 4294901760, %v557_v61  ;;  %p1307_p10 = pnand %p1306_p2, %p1302_p8 }
  0x46   : > { %357 = vmatmul.f32.vlgmr.msra.gmra.mxu0 %v1569_v25  ;;  %450 = vmatpush.msrb.mxu3 %v348_v3 }
  0x47   : > { %396 = vmatmul.f32.vlgmr.msra.gmra.mxu1 %v1549_v11 }
  0x48   : > { %512 = vmatpush.msrb.mxu1 %v348_v3  ;;  %452 = vmatpush.msrb.mxu3 %v350_v4  ;;  %v787_v3 = vand.u32 4294901760, %v786_v0 }
  0x4a   : > { %514 = vmatpush.msrb.mxu1 %v350_v4  ;;  %v788_v13 = vsub.f32 %v786_v0, %v787_v3 }
  0x4c   : > { %426 = vmatmul.f32.vlgmr.msrb.gmra.mxu2 %v1555_v15  ;;  %v789_v22 = vand.u32 4294901760, %v788_v13 }
  0x4d   : > { %456 = vmatmul.f32.vlgmr.msrb.gmra.mxu3 %v1561_v19 }
  0x4e   : > { %489 = vmatmul.f32.vlgmr.msrb.gmra.mxu0 %v1549_v11 }
  0x4f   : > { %516 = vmatmul.f32.vlgmr.msrb.gmra.mxu1 %v1549_v11 }
  0x54   : > { %431 = vmatmul.f32.gmra.mxu2 %v1552_v12 }
  0x55   : > { %462 = vmatmul.f32.gmra.mxu3 %v1558_v16 }
  0x56   : > { %493 = vmatmul.f32.gmra.mxu0 %v1546_v7 }
  0x57   : > { %520 = vmatmul.f32.gmra.mxu1 %v1546_v7 }
  0xc3   : > { %v358_v26 = vpop.f32.mrf.mxu0 }
  0xc4   : > { %v397_v29 = vpop.f32.mrf.mxu1 }
  0xc5   : > { %v398_v31 = vadd.f32 %v397_v29, %v358_v26  ;;  %v566_v26 = vand.u32 4294901760, %v565_v17 }
  0xc7   : > { %v366_v27 = vpop.f32.mrf.mxu2 }
  0xc8   : > { %v401_v28 = vpop.f32.mrf.mxu3 }
  0xc9   : > { %v402_v43 = vadd.f32 %v401_v28, %v366_v27 }
  0xcb   : > { %v490_v34 = vpop.f32.mrf.mxu0 }
  0xcc   : > { %v517_v37 = vpop.f32.mrf.mxu1 }
  0xcf   : > { %v427_v33 = vpop.f32.mrf.mxu2 }
  0xd0   : > { %v428_v35 = vadd.f32 %v427_v33, %v398_v31  ;;  %v457_v36 = vpop.f32.mrf.mxu3 }
  0xd2   : > { %v458_v39 = vadd.f32 %v457_v36, %v428_v35 }
  0xd3   : > { %v494_v50 = vpop.f32.mrf.mxu0 }
  0xd4   : > { %v491_v41 = vadd.f32 %v490_v34, %v458_v39  ;;  %v521_v57 = vpop.f32.mrf.mxu1 }
  0xd6   : > { %v518_v44 = vadd.f32 %v517_v37, %v491_v41 }
  0xd7   : > { %v432_v46 = vpop.f32.mrf.mxu2 }
  0xd8   : > { %v433_v47 = vadd.f32 %v432_v46, %v402_v43  ;;  %v463_v49 = vpop.f32.mrf.mxu3  ;;  %v552_v54 = vand.u32 4294901760, %v518_v44 }
  0xda   : > { %v464_v55 = vadd.f32 %v463_v49, %v433_v47  ;;  %v592_v1 = vsub.f32 %v518_v44, %v552_v54 }
  0xdc   : > { %v495_v60 = vadd.f32 %v494_v50, %v464_v55  ;;  %v593_v10 = vand.u32 4294901760, %v592_v1 }
  0xde   : > { %v522_v2 = vadd.f32 %v521_v57, %v495_v60  ;;  %v594_v21 = vsub.f32 %v592_v1, %v593_v10  ;;  %v927_v57 = vstv %s926_s18 }
  0xe0   : > { %v550_v4 = vand.u32 4294901760, %v522_v2  ;;  %v595_v27 = vand.u32 4294901760, %v594_v21 }
  0xe2   : > { %v586_v9 = vsub.f32 %v522_v2, %v550_v4  ;;  %551 = vmatpush.msra.mxu2 %v550_v4  ;;  %652 = vmatpush.msra.mxu1 %v550_v4 }
  0xe4   : > { %v587_v14 = vand.u32 4294901760, %v586_v9  ;;  %553 = vmatpush.msra.mxu2 %v552_v54  ;;  %622 = vmatpush.msra.mxu0 %v586_v9 }
  0xe5   : > { %654 = vmatpush.msra.mxu1 %v552_v54  ;;  %559 = vmatmul.f32.vlgmr.msra.gmra.mxu2 %v558_v5 }
  0xe6   : > { %v588_v20 = vsub.f32 %v586_v9, %v587_v14  ;;  %625 = vmatpush.msra.mxu0 %v592_v1  ;;  %685 = vmatpush.msrb.mxu2 %v587_v14 }
  0xe7   : > { %628 = vmatmul.f32.vlgmr.msra.gmra.mxu0 %v555_v42  ;;  %658 = vmatmul.f32.vlgmr.msra.gmra.mxu1 %v556_v51 }
  0xe8   : > { %689 = vmatpush.msrb.mxu2 %v593_v10  ;;  %v589_v23 = vand.u32 4294901760, %v588_v20  ;;  %745 = vmatpush.msrb.mxu0 %v744_v53 }
  0xe9   : > { %784 = vmatpush.msrb.mxu1 %v783_v18 }
  0xea   : > { %816 = vmatpush.msra.mxu2 %v780_v58  ;;  %590 = vmatpush.msra.mxu3 %v589_v23 }
  0xeb   : > { %747 = vmatpush.msrb.mxu0 %v746_v59  ;;  %790 = vmatpush.msrb.mxu1 %v789_v22 }
  0xec   : > { %819 = vmatpush.msra.mxu2 %v786_v0  ;;  %596 = vmatpush.msra.mxu3 %v595_v27 }
  0xed   : > { %879 = vmatpush.msra.mxu0 %v781_v63  ;;  %598 = vmatmul.f32.vlgmr.msra.gmra.mxu3 %v1584_v38 }
  0xee   : > { %567 = vmatmul.f32.gmra.mxu2 %v566_v26  ;;  %714 = vmatpush.msrb.mxu3 %v550_v4 }
  0xef   : > { %883 = vmatpush.msra.mxu0 %v787_v3  ;;  %664 = vmatmul.f32.gmra.mxu1 %v564_v6 }
  0xf0   : > { %633 = vmatmul.f32.gmra.mxu0 %v563_v62  ;;  %716 = vmatpush.msrb.mxu3 %v552_v54 }
  0xf1   : > { %908 = vmatpush.msra.mxu1 %v744_v53 }
  0xf2   : > { %846 = vmatpush.msra.mxu3 %v744_v53 }
  0xf3   : > { %910 = vmatpush.msra.mxu1 %v746_v59 }
  0xf4   : > { %848 = vmatpush.msra.mxu3 %v746_v59 }
  0xf5   : > { %602 = vmatmul.f32.gmra.mxu3 %v1588_v52 }
  0xf6   : > { %691 = vmatmul.f32.vlgmr.msrb.gmra.mxu2 %v1584_v38 }
  0xf7   : > { %792 = vmatmul.f32.vlgmr.msrb.gmra.mxu1 %v1549_v11 }
  0xf8   : > { %753 = vmatmul.f32.vlgmr.msrb.gmra.mxu0 %v1569_v25 }
  0xfd   : > { %718 = vmatmul.f32.vlgmr.msrb.gmra.mxu3 %v1584_v38 }
  0xfe   : > { %695 = vmatmul.f32.gmra.mxu2 %v1588_v52 }
  0xff   : > { %796 = vmatmul.f32.gmra.mxu1 %v1546_v7 }
 0x100   : > { %761 = vmatmul.f32.gmra.mxu0 %v1567_v24 }
 0x105   : > { %722 = vmatmul.f32.gmra.mxu3 %v1588_v52 }
 0x106   : > { %822 = vmatmul.f32.vlgmr.msra.gmra.mxu2 %v1555_v15 }
 0x107   : > { %912 = vmatmul.f32.vlgmr.msra.gmra.mxu1 %v1549_v11 }
 0x108   : > { %885 = vmatmul.f32.vlgmr.msra.gmra.mxu0 %v1549_v11 }
 0x10d   : > { %852 = vmatmul.f32.vlgmr.msra.gmra.mxu3 %v1561_v19 }
 0x10e   : > { %827 = vmatmul.f32.gmra.mxu2 %v1552_v12  ;;  %v1162_v12 = vld [vmem:[%s1658_s5] ss:$0 sm:$0xff] }
 0x10f   : > { %916 = vmatmul.f32.gmra.mxu1 %v1546_v7 }
 0x110   : > { %889 = vmatmul.f32.gmra.mxu0 %v1546_v7 }
 0x115   : > { %858 = vmatmul.f32.gmra.mxu3 %v1558_v16 }
 0x164   : > { %v629_v24 = vpop.f32.mrf.mxu0  ;;  %v659_v28 = vpop.f32.mrf.mxu1 }
 0x168   : > { %v560_v25 = vpop.f32.mrf.mxu2 }
 0x169   : > { %v561_v34 = vadd.f32 %v1162_v12, %v560_v25 }
 0x16c   : > { %v665_v31 = vpop.f32.mrf.mxu1 }
 0x16d   : > { %v634_v29 = vpop.f32.mrf.mxu0 }
 0x170   : > { %v599_v30 = vpop.f32.mrf.mxu3 }
 0x171   : > { %v568_v15 = vpop.f32.mrf.mxu2  ;;  %v600_v36 = vadd.f32 %v599_v30, %v561_v34 }
 0x172   : > { %v569_v38 = vadd.f32 %v1162_v12, %v568_v15 }
 0x173   : > { %v630_v37 = vadd.f32 %v629_v24, %v600_v36 }
 0x174   : > { %v793_v19 = vpop.f32.mrf.mxu1 }
 0x175   : > { %v754_v11 = vpop.f32.mrf.mxu0  ;;  %v660_v42 = vadd.f32 %v659_v28, %v630_v37 }
 0x176   : > { %v794_v45 = vadd.f32 %v793_v19, %v754_v11 }
 0x178   : > { %v603_v32 = vpop.f32.mrf.mxu3 }
 0x179   : > { %v692_v33 = vpop.f32.mrf.mxu2  ;;  %v604_v43 = vadd.f32 %v603_v32, %v569_v38 }
 0x17a   : > { %v693_v44 = vadd.f32 %v692_v33, %v660_v42 }
 0x17b   : > { %v635_v47 = vadd.f32 %v634_v29, %v604_v43 }
 0x17c   : > { %v797_v40 = vpop.f32.mrf.mxu1 }
 0x17d   : > { %v762_v16 = vpop.f32.mrf.mxu0  ;;  %v666_v53 = vadd.f32 %v665_v31, %v635_v47 }
 0x17e   : > { %v798_v60 = vadd.f32 %v797_v40, %v762_v16 }
 0x180   : > { %v719_v35 = vpop.f32.mrf.mxu3 }
 0x181   : > { %v696_v7 = vpop.f32.mrf.mxu2  ;;  %v720_v48 = vadd.f32 %v719_v35, %v693_v44 }
 0x182   : > { %v697_v59 = vadd.f32 %v696_v7, %v666_v53 }
 0x183   : > { %v726_v54 = vmax.f32 %v720_v48, 0.0 }
 0x184   : > { %v913_v51 = vpop.f32.mrf.mxu1 }
 0x185   : > { %v886_v46 = vpop.f32.mrf.mxu0  ;;  %v924_v62 = vmul.f32 %v923_v56, %v726_v54 }
 0x188   : > { %v723_v39 = vpop.f32.mrf.mxu3 }
 0x189   : > { %v823_v41 = vpop.f32.mrf.mxu2  ;;  %v724_v63 = vadd.f32 %v723_v39, %v697_v59 }
 0x18a   : > { %v824_v49 = vadd.f32 %v823_v41, %v794_v45 }
 0x18b   : > { %v727_v8 = vmax.f32 %v724_v63, 0.0 }
 0x18c   : > { %v917_v6 = vpop.f32.mrf.mxu1 }
 0x18d   : > { %v890_v3 = vpop.f32.mrf.mxu0  ;;  %v925_v13 = vmul.f32 %v923_v56, %v727_v8 }
 0x190   : > { %v853_v50 = vpop.f32.mrf.mxu3 }
 0x191   : > { %v854_v52 = vadd.f32 %v853_v50, %v824_v49  ;;  %v828_v58 = vpop.f32.mrf.mxu2 }
 0x192   : > { %v829_v1 = vadd.f32 %v828_v58, %v798_v60 }
 0x193   : > { %v887_v55 = vadd.f32 %v886_v46, %v854_v52 }
 0x195   : > { %v914_v61 = vadd.f32 %v913_v51, %v887_v55 }
 0x197   : > { %v928_v0 = vmul.f32 %v927_v57, %v914_v61 }
 0x198   : > { %v859_v2 = vpop.f32.mrf.mxu3 }
 0x199   : > { %v930_v4 = vadd.f32 %v928_v0, %v924_v62  ;;  %v860_v5 = vadd.f32 %v859_v2, %v829_v1 }
 0x19b   : > { %933 = vst.msk [vmem:[%s322_s10] sm:$0xff] %vm932_vm1, %v930_v4  ;;  %v891_v9 = vadd.f32 %v890_v3, %v860_v5 }
 0x19d   : > { %v918_v10 = vadd.f32 %v917_v6, %v891_v9 }
 0x19f   : > { %v929_v14 = vmul.f32 %v927_v57, %v918_v10 }
 0x1a1   : > { %v931_v17 = vadd.f32 %v929_v14, %v925_v13 }
 0x1a3   : > { %934 = vst.msk [vmem:[%s322_s10 + $0x8] sm:$0xff] %vm932_vm1, %v931_v17 }
 0x1a4   : > { %1310 = shalt.err (!%p1307_p10)
}
 0x1a5   : > { %s1366_s22 = smov 128   ;;  %s1367_s18 = smov 8  }
 0x1a6   : > { %1093 = dma.vmem_to_hbm [thread:$0]  (%p1497_p3), %s949_s0, 256, %s951_s12, %s936_s28, %s1366_s22, %s1366_s22, %s1367_s18  }
 0x1a7 PF: > { %s965_s15 = sand.u32 1, %s1345_s23   ;;  %p1668_p12 = scmp.ge.s32.totalorder %s1357_s26, 2 }
 0x1a8   : > { %s966_s19 = scalar_lea.sflag [#allocation5], %s965_s15 }
 0x1a9   : > { %p1110_p13 = pnand %p1668_p12, %p1441_p6 }
 0x1ab   : > { %p1111_p0 = pneg %p1110_p13 }
 0x1ad   : > { %1340 = dma.done.wait (%p1111_p0), %s966_s19, 256  }
 0x1ae   : > { %1342 = vsyncadd (%p1111_p0), %s966_s19, 4294967040  ;;  %p22_p5 = scmp.ge.s32.totalorder %s1479_s7, 4   ;;  %s1669_s23 = smov %s1349_s24 }
 0x1af   : > { %s1670_s24 = smov %s1353_s25  ;;  %s1671_s25 = smov %s1493_s11 }
 0x1b0   : > { %s1672_s26 = smov %s1479_s7  ;;  %24 = sbr.rel (!%p22_p5) target bundleno = 9 (0x9), region = 101 }
 0x1b5   :  { %972 = vsyncpa [#allocation4], 1 }
 0x1b6   :  { %974 = vsyncpa [#allocation4 + $0x1], 1 }
 0x1b7   :  { %975 = vsyncpa [#allocation7], 1 }
 0x1b8   :  { %976 = vsyncpa [#allocation10], 1 }
 0x1b9   :  { %977 = vsyncpa [#allocation5], 1 }
 0x1ba   :  { %979 = vsyncpa [#allocation5 + $0x1], 1 }

</bundles_post_ra>
